<compile_context>
chip_gen: v6e
topology: v6e:2x2x1
jax: 0.10.0
libtpu: 0.0.40
codegen_flags: <defaults>
</compile_context>

<pallas_src>
import jax
import jax.numpy as jnp
from jax.experimental import pallas as pl
from jax.experimental.pallas import tpu as pltpu


def _round_up(x: int, m: int) -> int:
    return (x + m - 1) // m * m


# --------------------------------------------------------------------------- #
# Kernel
# --------------------------------------------------------------------------- #
def _head_kernel(x_ref, w1_ref, b1_ref, w2_ref, b2_ref, o_ref, acc_ref):
    """One (batch-tile, inner-chunk) grid step.

    y[tile] = sum_n tanh(x[tile] @ W1[:, n] + b1[n]) @ W2[n, :]  + b2
    which equals tanh(x @ W1 + b1) @ W2 + b2 because tanh is elementwise.
    """
    n = pl.program_id(1)

    @pl.when(n == 0)
    def _init():
        acc_ref[...] = jnp.zeros_like(acc_ref)

    # dropout (eval mode) -> identity
    # TODO(synk): training-mode dropout (pltpu.prng_*) not implemented; eval only.
    x = x_ref[...].astype(jnp.bfloat16)                 # in-kernel cast (VPU)
    # dense: bf16 MXU matmul, f32 accumulation
    h = jnp.dot(x, w1_ref[...], preferred_element_type=jnp.float32)
    # bias + tanh in f32 (VPU + EUP; free filler under the MXU)
    h = jnp.tanh(h + b1_ref[...])
    # dropout (eval mode) -> identity
    # out_proj: second bf16 MXU pass, accumulate partial sums over inner chunks
    acc_ref[...] += jnp.dot(h.astype(jnp.bfloat16), w2_ref[...],
                            preferred_element_type=jnp.float32)

    @pl.when(n == pl.num_programs(1) - 1)
    def _finalize():
        o_ref[...] = (acc_ref[...] + b2_ref[...]).astype(o_ref.dtype)


# --------------------------------------------------------------------------- #
# One-time parameter preparation (hoisted out of the per-call path)
# --------------------------------------------------------------------------- #
def prepare_classification_head_params(w1, b1, w2, b2):
    """w1: [input_dim, inner_dim]; b1: [inner_dim];
    w2: [inner_dim, num_classes]; b2: [num_classes].

    Casts weights to bf16, biases to f32 row vectors, and pads the class
    dimension of W2/b2 up to a multiple of 128 lanes (lane-dense output)."""
    d_in, d_inner = w1.shape
    num_classes = w2.shape[1]
    c_pad = _round_up(num_classes, 128)

    w1_bf = w1.astype(jnp.bfloat16)
    w2_bf = w2.astype(jnp.bfloat16)
    b1_2d = b1.reshape(1, d_inner).astype(jnp.float32)
    b2_2d = b2.reshape(1, num_classes).astype(jnp.float32)
    if c_pad != num_classes:
        w2_bf = jnp.pad(w2_bf, ((0, 0), (0, c_pad - num_classes)))
        b2_2d = jnp.pad(b2_2d, ((0, 0), (0, c_pad - num_classes)))

    return {"w1": w1_bf, "b1": b1_2d, "w2": w2_bf, "b2": b2_2d,
            "num_classes": num_classes}


# --------------------------------------------------------------------------- #
# Tiling heuristics
# --------------------------------------------------------------------------- #
def _pick_batch_tile(B: int, block_b: int) -> int:
    """Batch tile: multiple of 16 (bf16 sublane packing); aim for >= 2 batch
    tiles so the 'parallel' axis can shard across the two v7x TensorCores."""
    block_b = max(16, (block_b // 16) * 16)
    if B <= 16:
        return B                          # single block == full array dim (legal)
    half = _round_up(pl.cdiv(B, 2), 16)   # >= 2 grid steps when possible
    tb = min(block_b, half)
    return max(16, (tb // 16) * 16)


def _pick_inner_chunk(d_inner: int, grid_b: int, block_inner: int) -> int:
    """Chunk the inner dim only in the single-batch-tile regime (otherwise the
    weights would be re-fetched once per batch tile)."""
    if grid_b > 1 or d_inner % 128 != 0 or d_inner <= block_inner:
        return d_inner
    c = max(128, (block_inner // 128) * 128)
    while c >= 128:
        if d_inner % c == 0:
            return c
        c -= 128
    return d_inner


# --------------------------------------------------------------------------- #
# Forward
# --------------------------------------------------------------------------- #
def bart_classification_head(x, params, *, block_b: int = 256,
                             block_inner: int = 512):
    """x: [B, input_dim]; params: output of prepare_classification_head_params."""
    B, d_in = x.shape
    w1, b1, w2, b2 = params["w1"], params["b1"], params["w2"], params["b2"]
    num_classes = params["num_classes"]
    assert w1.shape[0] == d_in, "input_dim mismatch"
    d_inner = w1.shape[1]
    c_pad = w2.shape[1]

    tb = _pick_batch_tile(B, block_b)
    grid_b = pl.cdiv(B, tb)               # partial boundary block handled by Pallas
    t_inner = _pick_inner_chunk(d_inner, grid_b, block_inner)
    grid_n = d_inner // t_inner

    # Honest VMEM budget: double-buffered blocks + f32 accumulator + headroom.
    blk_bytes = (tb * d_in * x.dtype.itemsize        # x tile
                 + d_in * t_inner * 2                # w1 chunk (bf16)
                 + 8 * t_inner * 4                   # b1 (f32, 8-sublane pad)
                 + t_inner * c_pad * 2               # w2 chunk (bf16)
                 + 8 * c_pad * 4                     # b2 (f32, 8-sublane pad)
                 + tb * c_pad * x.dtype.itemsize)    # out tile
    vmem_limit = 2 * blk_bytes + tb * c_pad * 4 + (4 << 20)
    vmem_limit = max(16 << 20, min(64 << 20, int(vmem_limit)))

    out = pl.pallas_call(
        _head_kernel,
        out_shape=jax.ShapeDtypeStruct((B, c_pad), x.dtype),
        grid=(grid_b, grid_n),
        in_specs=[
            # activations: tiled on batch (original dtype; cast happens in-kernel)
            pl.BlockSpec((tb, d_in), lambda i, n: (i, 0)),
            # weights/biases: chunked on the inner dim (constant when grid_n==1
            # -> fetched once and held resident in VMEM)
            pl.BlockSpec((d_in, t_inner), lambda i, n: (0, n)),
            pl.BlockSpec((1, t_inner), lambda i, n: (0, n)),
            pl.BlockSpec((t_inner, c_pad), lambda i, n: (n, 0)),
            pl.BlockSpec((1, c_pad), lambda i, n: (0, 0)),
        ],
        out_specs=pl.BlockSpec((tb, c_pad), lambda i, n: (i, 0)),
        scratch_shapes=[pltpu.VMEM((tb, c_pad), jnp.float32)],
        compiler_params=pltpu.CompilerParams(
            dimension_semantics=("parallel", "arbitrary"),  # megacore on batch
            vmem_limit_bytes=vmem_limit,
        ),
    )(x, w1, b1, w2, b2)

    # strip class-dim lane padding (batch was never padded)
    return out[:, :num_classes]


# --------------------------------------------------------------------------- #
# Self-test
# --------------------------------------------------------------------------- #
if __name__ == "__main__":
    input_dim, inner_dim, num_classes = 32, 64, 8
    pooler_dropout = 0.1  # eval mode -> identity; value unused

    key = jax.random.PRNGKey(0)
    kx, kw1, kb1, kw2, kb2, kx2, kw3, kb3, kx3 = jax.random.split(key, 9)

    # nn.Linear params, stored transposed (in, out); 1-D biases like PyTorch.
    w1 = jax.random.normal(kw1, (input_dim, inner_dim), dtype=jnp.float32) * 0.02
    b1 = jax.random.normal(kb1, (inner_dim,), dtype=jnp.float32) * 0.02
    w2 = jax.random.normal(kw2, (inner_dim, num_classes), dtype=jnp.float32) * 0.02
    b2 = jax.random.normal(kb2, (num_classes,), dtype=jnp.float32) * 0.02
    params = prepare_classification_head_params(w1, b1, w2, b2)  # once, at init

    def ref_fn(xx, a, c, d, e):
        return jnp.tanh(xx @ a + c[None, :]) @ d + e[None, :]

    # --- check 1: small batch, single tile, single inner chunk --------------
    x = jax.random.normal(kx, (8, input_dim), dtype=jnp.float32)
    out = bart_classification_head(x, params)
    jax.block_until_ready(out)
    assert out.shape == (8, num_classes)
    assert jnp.allclose(out, ref_fn(x, w1, b1, w2, b2), atol=2e-2, rtol=2e-2)

    # --- check 2: two batch tiles + partial boundary block (B=21, tb=16) ----
    x2 = jax.random.normal(kx2, (21, input_dim), dtype=jnp.float32)
    out2 = bart_classification_head(x2, params)
    jax.block_until_ready(out2)
    assert out2.shape == (21, num_classes)
    assert jnp.allclose(out2, ref_fn(x2, w1, b1, w2, b2), atol=2e-2, rtol=2e-2)

    # --- check 3: inner-dim chunked reduction path (grid_n > 1, accumulator) -
    inner2 = 256
    w1b = jax.random.normal(kw3, (input_dim, inner2), dtype=jnp.float32) * 0.02
    b1b = jax.random.normal(kb3, (inner2,), dtype=jnp.float32) * 0.02
    w2b = jax.random.normal(kw2, (inner2, num_classes), dtype=jnp.float32) * 0.02
    params_b = prepare_classification_head_params(w1b, b1b, w2b, b2)
    x3 = jax.random.normal(kx3, (4, input_dim), dtype=jnp.float32)
    out3 = bart_classification_head(x3, params_b, block_inner=128)
    jax.block_until_ready(out3)
    assert out3.shape == (4, num_classes)
    assert jnp.allclose(out3, ref_fn(x3, w1b, b1b, w2b, b2), atol=2e-2, rtol=2e-2)

    print("KERNEL_OK")
</pallas_src>

<mosaic_0001>
module attributes {stable_mosaic.version = 11 : i64} {
  func.func @_head_kernel(%arg0: i32, %arg1: i32, %arg2: memref<8x32xf32, #tpu.memory_space<vmem>>, %arg3: memref<32x64xbf16, #tpu.memory_space<vmem>>, %arg4: memref<1x64xf32, #tpu.memory_space<vmem>>, %arg5: memref<64x128xbf16, #tpu.memory_space<vmem>>, %arg6: memref<1x128xf32, #tpu.memory_space<vmem>>, %arg7: memref<8x128xf32, #tpu.memory_space<vmem>>, %arg8: memref<8x128xf32, #tpu.memory_space<vmem>>) attributes {dimension_semantics = [#tpu.dimension_semantics<parallel>, #tpu.dimension_semantics<arbitrary>], iteration_bounds = array<i64: 1, 1>, scalar_prefetch = 0 : i64, scratch_operands = 1 : i64, tpu.core_type = #tpu.core_type<tc>, window_params = [{transform_indices = @transform_0, window_bounds = array<i64: 8, 32>}, {transform_indices = @transform_1, window_bounds = array<i64: 32, 64>}, {transform_indices = @transform_2, window_bounds = array<i64: 1, 64>}, {transform_indices = @transform_3, window_bounds = array<i64: 64, 128>}, {pipeline_mode = #tpu.pipeline_mode<synchronous>, transform_indices = @transform_4, window_bounds = array<i64: 1, 128>}, {transform_indices = @transform_5, window_bounds = array<i64: 8, 128>}]} {
    %c0_i32 = arith.constant 0 : i32
    %0 = arith.cmpi eq, %arg1, %c0_i32 : i32
    %1 = arith.extui %0 : i1 to i32
    %c0_i32_0 = arith.constant 0 : i32
    %2 = arith.cmpi ne, %1, %c0_i32_0 : i32
    scf.if %2 {
      %cst_15 = arith.constant 0.000000e+00 : f32
      %20 = vector.broadcast %cst_15 : f32 to vector<8x128xf32>
      %c0_16 = arith.constant 0 : index
      %c0_17 = arith.constant 0 : index
      %21 = vector.load %arg8[%c0_16, %c0_17] : memref<8x128xf32, #tpu.memory_space<vmem>>, vector<8x128xf32>
      tpu.vector_store %arg8[%c0_16, %c0_17], %20 {strides = array<i32>} : memref<8x128xf32, #tpu.memory_space<vmem>>, vector<8x128xf32>,
    } else {
    }
    %c0 = arith.constant 0 : index
    %c0_1 = arith.constant 0 : index
    %3 = vector.load %arg2[%c0, %c0_1] : memref<8x32xf32, #tpu.memory_space<vmem>>, vector<8x32xf32>
    %4 = arith.truncf %3 : vector<8x32xf32> to vector<8x32xbf16>
    %c0_2 = arith.constant 0 : index
    %c0_3 = arith.constant 0 : index
    %5 = vector.load %arg3[%c0_2, %c0_3] : memref<32x64xbf16, #tpu.memory_space<vmem>>, vector<32x64xbf16>
    %cst = arith.constant dense<0.000000e+00> : vector<8x64xf32>
    %6 = tpu.matmul %4, %5, %cst {dimension_numbers = #tpu.dot_dimension_numbers<[1], [0], [0], [1], [0, 0, 1, 1], [], []>} : vector<8x32xbf16>, vector<32x64xbf16>, vector<8x64xf32> -> vector<8x64xf32>
    %c0_4 = arith.constant 0 : index
    %c0_5 = arith.constant 0 : index
    %7 = vector.load %arg4[%c0_4, %c0_5] : memref<1x64xf32, #tpu.memory_space<vmem>>, vector<1x64xf32>
    %8 = vector.broadcast %7 : vector<1x64xf32> to vector<8x64xf32>
    %9 = arith.addf %6, %8 : vector<8x64xf32>
    %10 = math.tanh %9 : vector<8x64xf32>
    %c0_6 = arith.constant 0 : index
    %c0_7 = arith.constant 0 : index
    %11 = vector.load %arg8[%c0_6, %c0_7] : memref<8x128xf32, #tpu.memory_space<vmem>>, vector<8x128xf32>
    %12 = arith.truncf %10 : vector<8x64xf32> to vector<8x64xbf16>
    %c0_8 = arith.constant 0 : index
    %c0_9 = arith.constant 0 : index
    %13 = vector.load %arg5[%c0_8, %c0_9] : memref<64x128xbf16, #tpu.memory_space<vmem>>, vector<64x128xbf16>
    %cst_10 = arith.constant dense<0.000000e+00> : vector<8x128xf32>
    %14 = tpu.matmul %12, %13, %cst_10 {dimension_numbers = #tpu.dot_dimension_numbers<[1], [0], [0], [1], [0, 0, 1, 1], [], []>} : vector<8x64xbf16>, vector<64x128xbf16>, vector<8x128xf32> -> vector<8x128xf32>
    %15 = arith.addf %11, %14 : vector<8x128xf32>
    %c0_11 = arith.constant 0 : index
    %c0_12 = arith.constant 0 : index
    %16 = vector.load %arg8[%c0_11, %c0_12] : memref<8x128xf32, #tpu.memory_space<vmem>>, vector<8x128xf32>
    tpu.vector_store %arg8[%c0_11, %c0_12], %15 {strides = array<i32>} : memref<8x128xf32, #tpu.memory_space<vmem>>, vector<8x128xf32>,
    %c0_i32_13 = arith.constant 0 : i32
    %17 = arith.cmpi eq, %arg1, %c0_i32_13 : i32
    %18 = arith.extui %17 : i1 to i32
    %c0_i32_14 = arith.constant 0 : i32
    %19 = arith.cmpi ne, %18, %c0_i32_14 : i32
    scf.if %19 {
      %c0_15 = arith.constant 0 : index
      %c0_16 = arith.constant 0 : index
      %20 = vector.load %arg8[%c0_15, %c0_16] : memref<8x128xf32, #tpu.memory_space<vmem>>, vector<8x128xf32>
      %c0_17 = arith.constant 0 : index
      %c0_18 = arith.constant 0 : index
      %21 = vector.load %arg6[%c0_17, %c0_18] : memref<1x128xf32, #tpu.memory_space<vmem>>, vector<1x128xf32>
      %22 = vector.broadcast %21 : vector<1x128xf32> to vector<8x128xf32>
      %23 = arith.addf %20, %22 : vector<8x128xf32>
      %c0_19 = arith.constant 0 : index
      %c0_20 = arith.constant 0 : index
      %24 = vector.load %arg7[%c0_19, %c0_20] : memref<8x128xf32, #tpu.memory_space<vmem>>, vector<8x128xf32>
      tpu.vector_store %arg7[%c0_19, %c0_20], %23 {strides = array<i32>} : memref<8x128xf32, #tpu.memory_space<vmem>>, vector<8x128xf32>,
    } else {
    }
    return
  }
  func.func @transform_0(%arg0: i32, %arg1: i32) -> (i32, i32) {
    %c0_i32 = arith.constant 0 : i32
    %c0_i32_0 = arith.constant 0 : i32
    return %arg0, %c0_i32 : i32, i32
  }
  func.func @transform_1(%arg0: i32, %arg1: i32) -> (i32, i32) {
    %c0_i32 = arith.constant 0 : i32
    %c0_i32_0 = arith.constant 0 : i32
    return %c0_i32, %arg1 : i32, i32
  }
  func.func @transform_2(%arg0: i32, %arg1: i32) -> (i32, i32) {
    %c0_i32 = arith.constant 0 : i32
    %c0_i32_0 = arith.constant 0 : i32
    return %c0_i32, %arg1 : i32, i32
  }
  func.func @transform_3(%arg0: i32, %arg1: i32) -> (i32, i32) {
    %c0_i32 = arith.constant 0 : i32
    %c0_i32_0 = arith.constant 0 : i32
    return %arg1, %c0_i32 : i32, i32
  }
  func.func @transform_4(%arg0: i32, %arg1: i32) -> (i32, i32) {
    %c0_i32 = arith.constant 0 : i32
    %c0_i32_0 = arith.constant 0 : i32
    %c0_i32_1 = arith.constant 0 : i32
    return %c0_i32, %c0_i32_0 : i32, i32
  }
  func.func @transform_5(%arg0: i32, %arg1: i32) -> (i32, i32) {
    %c0_i32 = arith.constant 0 : i32
    %c0_i32_0 = arith.constant 0 : i32
    return %arg0, %c0_i32 : i32, i32
  }
}

</mosaic_0001>

<bundles_post_ra>
// kernel: tpu_custom_call.1
= control target key start
LH: loop header
LB: loop body
LE: loop exit
PB: predicated region body
PF: predicated region fallthrough
CT: control target
= control target key end

     0   :  { %10 = vsyncpa [#allocation4], 0  ;;  %s441_s0 = inlined_call_operand.hbm [shape: f32[8,32], index: 0, kind: input, shape index: {}]   ;;  %s442_s1 = inlined_call_operand.hbm [shape: bf16[32,64], index: 1, kind: input, shape index: {}]   ;;  %s443_s2 = inlined_call_operand.vmem [shape: f32[1,64], index: 2, kind: input, shape index: {}]   ;;  %s444_s3 = inlined_call_operand.hbm [shape: bf16[64,128], index: 3, kind: input, shape index: {}]   ;;  %s445_s4 = inlined_call_operand.vmem [shape: f32[1,128], index: 4, kind: input, shape index: {}]   ;;  %s446_s5 = inlined_call_operand.hbm [shape: f32[8,128], index: 5, kind: output, shape index: {}]  }
   0x1   :  { %11 = vsyncpa [#allocation7], 0 }
   0x2   :  { %12 = vsyncpa [#allocation5], 0  ;;  %s385_s18 = smov [#allocation6]  }
   0x3   :  { %s28_s19 = sshll.u32 %s385_s18, 4  ;;  %s29_s19 = int_to_ptr.vmem [resolvable:$true] %s28_s19 }
   0x4   :  { %s307_s20 = scalar_lea.vmem %s29_s19, 256  ;;  %p312_p1 = scmp.lt.s32.totalorder %s29_s19, %s29_s19 }
   0x5   :  { %p308_p0 = scmp.ne.s32.totalorder %s29_s19, %s307_s20  ;;  %p313_p2 = scmp.lt.s32.totalorder %s307_s20, %s307_s20 }
   0x7   :  { %p314_p3 = por %p313_p2, %p312_p1 }
   0x9   :  { %p315_p4 = pnand %p314_p3, %p308_p0 }
   0xb   :  { %318 = shalt.err (!%p315_p4)
}
   0xc   :  { %s386_s21 = smov 64   ;;  %s387_s22 = smov 4  }
   0xd   :  { %34 = dma.hbm_to_vmem [thread:$0]  %s442_s1, 256, %s29_s19, [#allocation7], %s386_s21, %s386_s21, %s387_s22  }
   0xe   :  { %s388_s25 = smov [#allocation3]   ;;  %s389_s27 = smov [#allocation8]  }
   0xf   :  { %s19_s26 = sshll.u32 %s388_s25, 4  ;;  %s42_s28 = sshll.u32 %s389_s27, 4  ;;  %s20_s26 = int_to_ptr.vmem [resolvable:$true] %s19_s26  ;;  %s43_s28 = int_to_ptr.vmem [resolvable:$true] %s42_s28 }
  0x10   :  { %s327_s29 = scalar_lea.vmem %s20_s26, 128  ;;  %p332_p6 = scmp.lt.s32.totalorder %s20_s26, %s20_s26 }
  0x11   :  { %p328_p5 = scmp.ne.s32.totalorder %s20_s26, %s327_s29  ;;  %p333_p7 = scmp.lt.s32.totalorder %s327_s29, %s327_s29 }
  0x13   :  { %p334_p8 = por %p333_p7, %p332_p6 }
  0x15   :  { %p335_p9 = pnand %p334_p8, %p328_p5 }
  0x17   :  { %338 = shalt.err (!%p335_p9)
}
  0x18   :  { %22 = dma.hbm_to_vmem [thread:$0]  %s441_s0, 128, %s20_s26, [#allocation4]  }
  0x19   :  { %s347_s7 = scalar_lea.vmem %s43_s28, 512  ;;  %p352_p11 = scmp.lt.s32.totalorder %s43_s28, %s43_s28 }
  0x1a   :  { %p348_p10 = scmp.ne.s32.totalorder %s43_s28, %s347_s7  ;;  %p353_p12 = scmp.lt.s32.totalorder %s347_s7, %s347_s7 }
  0x1c   :  { %p354_p13 = por %p353_p12, %p352_p11 }
  0x1e   :  { %p355_p0 = pnand %p354_p13, %p348_p10 }
  0x20   :  { %358 = shalt.err (!%p355_p0)
}
  0x21   :  { %48 = dma.hbm_to_vmem [thread:$0]  %s444_s3, 512, %s43_s28, [#allocation7], %s386_s21, %s386_s21, %s387_s22  }
  0x22   :  { %379 = dma.done.wait [#allocation4], 128  }
  0x23   :  { %380 = vsyncadd [#allocation4], 4294967168 }
  0x24   :  { %381 = dma.done.wait [#allocation7], 768  }
  0x25   :  { %382 = vsyncadd [#allocation7], 4294966528  ;;  %v390_v0 = vmov 0.0   ;;  %vm391_vm0 = vmmov 0   ;;  %v291_v1 = vld [vmem:[#allocation6 + $0x8] sm:$0xff]   ;;  %v292_v2 = vld [vmem:[#allocation6] sm:$0xff]  }
  0x26   :  { %263 = vmatprep.subr.bf16.mxu0 %v390_v0  ;;  %267 = vmatprep.mubr.msk.bf16.mxu0 %vm391_vm0, %v390_v0  ;;  %v66_v3 = vld [vmem:[#allocation3] sm:$0xff]  ;;  %vm91_vm1 = vcmask 261120   ;;  %v293_v5 = vld [vmem:[#allocation8 + $0x18] sm:$0xff]   ;;  %v294_v6 = vld [vmem:[#allocation8 + $0x10] sm:$0xff]   ;;  %vm170_vm2 = vcmask 523264   ;;  %s392_s11 = smov [#allocation9]  }
  0x27   :  { %271 = vmatprep.subr.bf16.mxu1 %v390_v0  ;;  %279 = vmatprep.mubr.msk.bf16.mxu1 %vm391_vm0, %v390_v0  ;;  %v67_v4 = vpack.c.bf16 %v66_v3, %v66_v3  ;;  %v295_v7 = vld [vmem:[#allocation8 + $0x8] sm:$0xff]   ;;  %v296_v8 = vld [vmem:[#allocation8] sm:$0xff]   ;;  %s235_s12 = sshll.u32 %s392_s11, 4  ;;  %s236_s12 = int_to_ptr.vmem [resolvable:$true] %s235_s12 }
  0x28   :  { %264 = vmatpush3.bf16.msra.mxu0 %v291_v1  ;;  %272 = vmatpush3.bf16.msra.mxu1 %v293_v5  ;;  %v245_v9 = vld [vmem:[%s443_s2] ss:$0 sm:$0xff]  ;;  %s359_s2 = scalar_lea.vmem %s236_s12, 128  ;;  %p364_p2 = scmp.lt.s32.totalorder %s236_s12, %s236_s12 }
  0x29   :  { %265 = vmatprep.subr.bf16.mxu0 %v390_v0  ;;  %273 = vmatprep.subr.bf16.mxu1 %v390_v0  ;;  %v254_v17 = vld [vmem:[%s445_s4] ss:$0 sm:$0xff]  ;;  %p360_p1 = scmp.ne.s32.totalorder %s236_s12, %s359_s2  ;;  %p365_p3 = scmp.lt.s32.totalorder %s359_s2, %s359_s2 }
  0x2b   :  { %p366_p4 = por %p365_p3, %p364_p2 }
  0x2c   :  { %266 = vmatpush3.bf16.msra.mxu0 %v292_v2  ;;  %274 = vmatpush3.bf16.msra.mxu1 %v294_v6 }
  0x2d   :  { %275 = vmatprep.subr.bf16.mxu1 %v390_v0  ;;  %p367_p5 = pnand %p366_p4, %p360_p1 }
  0x2f   :  { %268 = vmatmul.mubr.msk.bf16.vlgmr.msra.gmra.mxu0 %vm91_vm1, %v67_v4 }
  0x30   :  { %276 = vmatpush3.bf16.msra.mxu1 %v295_v7 }
  0x31   :  { %277 = vmatprep.subr.bf16.mxu1 %v390_v0 }
  0x34   :  { %278 = vmatpush3.bf16.msra.mxu1 %v296_v8 }
  0xef   :  { %v129_v10 = vpop.f32.mrf.mxu0 }
  0xf0   :  { %v130_v11 = vadd.f32 %v245_v9, %v129_v10 }
  0xf1   :  { %v269_v12 = vpop.f32.mrf.mxu0 }
  0xf2   :  { %297 = vtanh.f32 %v130_v11 }
  0xf3   :  { %v132_v13 = vpop.f32.mrf.mxu0 }
  0xf5   :  { %v270_v14 = vpop.f32.mrf.mxu0 }
  0xff   :  { %v298_v15 = vpop.eup %297 }
 0x100   :  { %v137_v16 = vpack.c.bf16 %v298_v15, %v298_v15 }
 0x102   :  { %280 = vmatmul.mubr.msk.bf16.vlgmr.msra.gmra.mxu1 %vm170_vm2, %v137_v16 }
 0x1c2   :  { %v208_v18 = vpop.f32.mrf.mxu1 }
 0x1c3   :  { %v227_v19 = vadd.f32 %v254_v17, %v208_v18 }
 0x1c4   :  { %v281_v20 = vpop.f32.mrf.mxu1 }
 0x1c5   :  { %228 = vst [vmem:[#allocation9] sm:$0xff] %v227_v19 }
 0x1c6   :  { %v211_v21 = vpop.f32.mrf.mxu1 }
 0x1c7   :  { %370 = shalt.err (!%p367_p5)
}
 0x1c8   :  { %238 = dma.vmem_to_hbm [thread:$0]  %s236_s12, 128, %s446_s5, [#allocation5]   ;;  %v282_v22 = vpop.f32.mrf.mxu1 }
 0x1c9   :  { %383 = dma.done.wait [#allocation5], 128  }
 0x1ca   :  { %384 = vsyncadd [#allocation5], 4294967168 }
 0x1cb   :  { %242 = vsyncpa [#allocation4], 1 }
 0x1cc   :  { %243 = vsyncpa [#allocation7], 1 }
 0x1cd   :  { %244 = vsyncpa [#allocation5], 1 }

</bundles_post_ra>
